<compile_context>
chip_gen: v6e
topology: v6e:2x2x1
jax: 0.10.0
libtpu: 0.0.40
codegen_flags: <defaults>
</compile_context>

<pallas_src>
import functools

import jax
import jax.numpy as jnp
from jax.experimental import pallas as pl
from jax.experimental.pallas import tpu as pltpu


def _complex_dropout_kernel(seed_ref, real_ref, imag_ref, out_r_ref, out_i_ref,
                            *, p, block_rows, lanes):
    # Hoisted trace-time constants.
    keep_threshold = jnp.uint32(min(int((1.0 - p) * 4294967296.0), 4294967295))
    scale = jnp.float32(1.0 / (1.0 - p))
    zero = jnp.float32(0.0)

    shape = (block_rows, lanes)
    row = jax.lax.broadcasted_iota(jnp.int32, shape, 0)
    col = jax.lax.broadcasted_iota(jnp.int32, shape, 1)
    block_start = pl.program_id(0) * block_rows
    # Global element index within the (padded) plane -> unique per element,
    # independent across grid blocks / TensorCores.
    gidx = ((block_start + row) * lanes + col).astype(jnp.uint32)

    seed_mix = seed_ref[0].astype(jnp.uint32) * jnp.uint32(0x9E3779B9)

    def _rand_bits(stream):
        # lowbias32-style integer hash -> uniform uint32 bits per element.
        h = gidx * jnp.uint32(2) + jnp.uint32(stream) + seed_mix
        h = h ^ (h >> jnp.uint32(16))
        h = h * jnp.uint32(0x7FEB352D)
        h = h ^ (h >> jnp.uint32(15))
        h = h * jnp.uint32(0x846CA68B)
        h = h ^ (h >> jnp.uint32(16))
        return h

    keep_r = _rand_bits(0) < keep_threshold   # independent streams for
    keep_i = _rand_bits(1) < keep_threshold   # real and imaginary parts

    out_r_ref[...] = jnp.where(keep_r, real_ref[...] * scale, zero)
    out_i_ref[...] = jnp.where(keep_i, imag_ref[...] * scale, zero)


def complex_dropout(x, p=0.5, training=True, seed=0):
    """Pallas TPU implementation of ComplexDropout.forward."""
    if not training or p == 0.0:
        return x
    if p >= 1.0:
        return jnp.zeros_like(x)

    real = jnp.real(x).astype(jnp.float32)
    imag = jnp.imag(x).astype(jnp.float32)
    orig_shape = real.shape
    n = real.size

    # Lane-dense 2D view (reshape is free when n divides evenly).
    lanes = next((l for l in (512, 256, 128) if n % l == 0), 128)
    rows = -(-n // lanes)

    # ~2 MiB f32 per block buffer; double-buffered 2-in/2-out stays well under
    # the 32 MiB scoped-VMEM default (v7x included).
    max_block_rows = max(8, (512 * 1024) // lanes)
    if rows <= max_block_rows:
        block_rows = rows
    else:
        block_rows = max_block_rows                       # multiple of 8
        rows = -(-rows // block_rows) * block_rows        # exact grid coverage

    pad = rows * lanes - n
    # TODO(synk): for ragged sizes, handle the tail in-kernel with a masked
    # store instead of this XLA pad/slice round trip.

    def _as2d(a):
        a = a.reshape(-1)
        if pad:
            a = jnp.pad(a, (0, pad))
        return a.reshape(rows, lanes)

    rf, imf = _as2d(real), _as2d(imag)
    seed_arr = jnp.asarray([seed], dtype=jnp.int32)

    kernel = functools.partial(_complex_dropout_kernel, p=float(p),
                               block_rows=block_rows, lanes=lanes)
    grid = (rows // block_rows,)

    out_r, out_i = pl.pallas_call(
        kernel,
        out_shape=(
            jax.ShapeDtypeStruct((rows, lanes), jnp.float32),
            jax.ShapeDtypeStruct((rows, lanes), jnp.float32),
        ),
        grid_spec=pltpu.PrefetchScalarGridSpec(
            num_scalar_prefetch=1,          # seed lands in SMEM
            grid=grid,
            in_specs=[
                pl.BlockSpec((block_rows, lanes), lambda i, seed: (i, 0)),
                pl.BlockSpec((block_rows, lanes), lambda i, seed: (i, 0)),
            ],
            out_specs=[
                pl.BlockSpec((block_rows, lanes), lambda i, seed: (i, 0)),
                pl.BlockSpec((block_rows, lanes), lambda i, seed: (i, 0)),
            ],
        ),
        compiler_params=pltpu.CompilerParams(
            dimension_semantics=("parallel",),   # shard blocks across TCs (v7x)
        ),
    )(seed_arr, rf, imf)

    if pad:
        out_r = out_r.reshape(-1)[:n]
        out_i = out_i.reshape(-1)[:n]
    out_r = out_r.reshape(orig_shape)
    out_i = out_i.reshape(orig_shape)
    return jax.lax.complex(out_r, out_i)


if __name__ == "__main__":
    key = jax.random.PRNGKey(0)
    kr, ki = jax.random.split(key)

    B, C, H, W = 2, 4, 16, 16
    xr = jax.random.normal(kr, (B, C, H, W), dtype=jnp.float32)
    xi = jax.random.normal(ki, (B, C, H, W), dtype=jnp.float32)
    x = jax.lax.complex(xr, xi)

    p = 0.5
    y = complex_dropout(x, p=p, training=True, seed=1234)
    y = jax.block_until_ready(y)

    # Sanity checks: surviving entries equal x * 1/(1-p), dropped entries are
    # exactly zero; keep-rate roughly (1 - p); eval mode is identity.
    yr, yi = jnp.real(y), jnp.imag(y)
    scale = 1.0 / (1.0 - p)
    kept_r = yr != 0.0
    kept_i = yi != 0.0
    assert jnp.allclose(jnp.where(kept_r, yr, 0.0),
                        jnp.where(kept_r, xr * scale, 0.0), atol=1e-5)
    assert jnp.allclose(jnp.where(kept_i, yi, 0.0),
                        jnp.where(kept_i, xi * scale, 0.0), atol=1e-5)
    rate_r = float(jnp.mean(kept_r.astype(jnp.float32)))
    rate_i = float(jnp.mean(kept_i.astype(jnp.float32)))
    assert 0.3 < rate_r < 0.7 and 0.3 < rate_i < 0.7
    # Real/imag masks should not be identical (independent dropout calls).
    assert bool(jnp.any(kept_r != kept_i))

    y_eval = jax.block_until_ready(complex_dropout(x, p=p, training=False))
    assert jnp.allclose(jnp.real(y_eval), xr) and jnp.allclose(jnp.imag(y_eval), xi)

    print("KERNEL_OK")
</pallas_src>

<mosaic_0001>
module attributes {stable_mosaic.version = 11 : i64} {
  func.func @_complex_dropout_kernel(%arg0: i32, %arg1: memref<1xi32, #tpu.memory_space<smem>>, %arg2: memref<4x512xf32, #tpu.memory_space<vmem>>, %arg3: memref<4x512xf32, #tpu.memory_space<vmem>>, %arg4: memref<4x512xf32, #tpu.memory_space<vmem>>, %arg5: memref<4x512xf32, #tpu.memory_space<vmem>>) attributes {dimension_semantics = [#tpu.dimension_semantics<parallel>], iteration_bounds = array<i64: 1>, scalar_prefetch = 1 : i64, scratch_operands = 0 : i64, tpu.core_type = #tpu.core_type<tc>, window_params = [{transform_indices = @transform_0, window_bounds = array<i64: 4, 512>}, {transform_indices = @transform_1, window_bounds = array<i64: 4, 512>}, {transform_indices = @transform_2, window_bounds = array<i64: 4, 512>}, {transform_indices = @transform_3, window_bounds = array<i64: 4, 512>}]} {
    %0 = tpu.iota {dimensions = array<i32: 0>} : vector<4x512xi32>
    %1 = tpu.iota {dimensions = array<i32: 1>} : vector<4x512xi32>
    %c4_i32 = arith.constant 4 : i32
    %2 = arith.muli %arg0, %c4_i32 : i32
    %3 = vector.broadcast %2 : i32 to vector<4x512xi32>
    %4 = arith.addi %3, %0 : vector<4x512xi32>
    %c512_i32 = arith.constant 512 : i32
    %5 = vector.broadcast %c512_i32 : i32 to vector<4x512xi32>
    %6 = arith.muli %4, %5 : vector<4x512xi32>
    %7 = arith.addi %6, %1 : vector<4x512xi32>
    %c0 = arith.constant 0 : index
    %8 = memref.load %arg1[%c0] : memref<1xi32, #tpu.memory_space<smem>>
    %c-1640531527_i32 = arith.constant -1640531527 : i32
    %9 = arith.muli %8, %c-1640531527_i32 : i32
    %c2_i32 = arith.constant 2 : i32
    %10 = vector.broadcast %c2_i32 : i32 to vector<4x512xi32>
    %11 = arith.muli %7, %10 : vector<4x512xi32>
    %c0_i32 = arith.constant 0 : i32
    %12 = vector.broadcast %c0_i32 : i32 to vector<4x512xi32>
    %13 = arith.addi %11, %12 : vector<4x512xi32>
    %14 = vector.broadcast %9 : i32 to vector<4x512xi32>
    %15 = arith.addi %13, %14 : vector<4x512xi32>
    %c16_i32 = arith.constant 16 : i32
    %16 = vector.broadcast %c16_i32 : i32 to vector<4x512xi32>
    %17 = arith.shrui %15, %16 : vector<4x512xi32>
    %18 = arith.xori %15, %17 : vector<4x512xi32>
    %c2146121005_i32 = arith.constant 2146121005 : i32
    %19 = vector.broadcast %c2146121005_i32 : i32 to vector<4x512xi32>
    %20 = arith.muli %18, %19 : vector<4x512xi32>
    %c15_i32 = arith.constant 15 : i32
    %21 = vector.broadcast %c15_i32 : i32 to vector<4x512xi32>
    %22 = arith.shrui %20, %21 : vector<4x512xi32>
    %23 = arith.xori %20, %22 : vector<4x512xi32>
    %c-2073254261_i32 = arith.constant -2073254261 : i32
    %24 = vector.broadcast %c-2073254261_i32 : i32 to vector<4x512xi32>
    %25 = arith.muli %23, %24 : vector<4x512xi32>
    %c16_i32_0 = arith.constant 16 : i32
    %26 = vector.broadcast %c16_i32_0 : i32 to vector<4x512xi32>
    %27 = arith.shrui %25, %26 : vector<4x512xi32>
    %28 = arith.xori %25, %27 : vector<4x512xi32>
    %c-2147483648_i32 = arith.constant -2147483648 : i32
    %29 = vector.broadcast %c-2147483648_i32 : i32 to vector<4x512xi32>
    %30 = arith.cmpi ult, %28, %29 : vector<4x512xi32>
    %c2_i32_1 = arith.constant 2 : i32
    %31 = vector.broadcast %c2_i32_1 : i32 to vector<4x512xi32>
    %32 = arith.muli %7, %31 : vector<4x512xi32>
    %c1_i32 = arith.constant 1 : i32
    %33 = vector.broadcast %c1_i32 : i32 to vector<4x512xi32>
    %34 = arith.addi %32, %33 : vector<4x512xi32>
    %35 = vector.broadcast %9 : i32 to vector<4x512xi32>
    %36 = arith.addi %34, %35 : vector<4x512xi32>
    %c16_i32_2 = arith.constant 16 : i32
    %37 = vector.broadcast %c16_i32_2 : i32 to vector<4x512xi32>
    %38 = arith.shrui %36, %37 : vector<4x512xi32>
    %39 = arith.xori %36, %38 : vector<4x512xi32>
    %c2146121005_i32_3 = arith.constant 2146121005 : i32
    %40 = vector.broadcast %c2146121005_i32_3 : i32 to vector<4x512xi32>
    %41 = arith.muli %39, %40 : vector<4x512xi32>
    %c15_i32_4 = arith.constant 15 : i32
    %42 = vector.broadcast %c15_i32_4 : i32 to vector<4x512xi32>
    %43 = arith.shrui %41, %42 : vector<4x512xi32>
    %44 = arith.xori %41, %43 : vector<4x512xi32>
    %c-2073254261_i32_5 = arith.constant -2073254261 : i32
    %45 = vector.broadcast %c-2073254261_i32_5 : i32 to vector<4x512xi32>
    %46 = arith.muli %44, %45 : vector<4x512xi32>
    %c16_i32_6 = arith.constant 16 : i32
    %47 = vector.broadcast %c16_i32_6 : i32 to vector<4x512xi32>
    %48 = arith.shrui %46, %47 : vector<4x512xi32>
    %49 = arith.xori %46, %48 : vector<4x512xi32>
    %c-2147483648_i32_7 = arith.constant -2147483648 : i32
    %50 = vector.broadcast %c-2147483648_i32_7 : i32 to vector<4x512xi32>
    %51 = arith.cmpi ult, %49, %50 : vector<4x512xi32>
    %c0_8 = arith.constant 0 : index
    %c0_9 = arith.constant 0 : index
    %52 = vector.load %arg2[%c0_8, %c0_9] : memref<4x512xf32, #tpu.memory_space<vmem>>, vector<4x512xf32>
    %cst = arith.constant 2.000000e+00 : f32
    %53 = vector.broadcast %cst : f32 to vector<4x512xf32>
    %54 = arith.mulf %52, %53 : vector<4x512xf32>
    %cst_10 = arith.constant 0.000000e+00 : f32
    %55 = vector.broadcast %cst_10 : f32 to vector<4x512xf32>
    %56 = arith.select %30, %54, %55 : vector<4x512xi1>, vector<4x512xf32>
    %c0_11 = arith.constant 0 : index
    %c0_12 = arith.constant 0 : index
    %57 = vector.load %arg4[%c0_11, %c0_12] : memref<4x512xf32, #tpu.memory_space<vmem>>, vector<4x512xf32>
    tpu.vector_store %arg4[%c0_11, %c0_12], %56 {strides = array<i32>} : memref<4x512xf32, #tpu.memory_space<vmem>>, vector<4x512xf32>,
    %c0_13 = arith.constant 0 : index
    %c0_14 = arith.constant 0 : index
    %58 = vector.load %arg3[%c0_13, %c0_14] : memref<4x512xf32, #tpu.memory_space<vmem>>, vector<4x512xf32>
    %cst_15 = arith.constant 2.000000e+00 : f32
    %59 = vector.broadcast %cst_15 : f32 to vector<4x512xf32>
    %60 = arith.mulf %58, %59 : vector<4x512xf32>
    %cst_16 = arith.constant 0.000000e+00 : f32
    %61 = vector.broadcast %cst_16 : f32 to vector<4x512xf32>
    %62 = arith.select %51, %60, %61 : vector<4x512xi1>, vector<4x512xf32>
    %c0_17 = arith.constant 0 : index
    %c0_18 = arith.constant 0 : index
    %63 = vector.load %arg5[%c0_17, %c0_18] : memref<4x512xf32, #tpu.memory_space<vmem>>, vector<4x512xf32>
    tpu.vector_store %arg5[%c0_17, %c0_18], %62 {strides = array<i32>} : memref<4x512xf32, #tpu.memory_space<vmem>>, vector<4x512xf32>,
    return
  }
  func.func @transform_0(%arg0: i32, %arg1: memref<1xi32, #tpu.memory_space<smem>>) -> (i32, i32) {
    %c0_i32 = arith.constant 0 : i32
    %c0_i32_0 = arith.constant 0 : i32
    return %arg0, %c0_i32 : i32, i32
  }
  func.func @transform_1(%arg0: i32, %arg1: memref<1xi32, #tpu.memory_space<smem>>) -> (i32, i32) {
    %c0_i32 = arith.constant 0 : i32
    %c0_i32_0 = arith.constant 0 : i32
    return %arg0, %c0_i32 : i32, i32
  }
  func.func @transform_2(%arg0: i32, %arg1: memref<1xi32, #tpu.memory_space<smem>>) -> (i32, i32) {
    %c0_i32 = arith.constant 0 : i32
    %c0_i32_0 = arith.constant 0 : i32
    return %arg0, %c0_i32 : i32, i32
  }
  func.func @transform_3(%arg0: i32, %arg1: memref<1xi32, #tpu.memory_space<smem>>) -> (i32, i32) {
    %c0_i32 = arith.constant 0 : i32
    %c0_i32_0 = arith.constant 0 : i32
    return %arg0, %c0_i32 : i32, i32
  }
}

</mosaic_0001>

<bundles_post_ra>
// kernel: tpu_custom_call.1
= control target key start
LH: loop header
LB: loop body
LE: loop exit
PB: predicated region body
PF: predicated region fallthrough
CT: control target
= control target key end

     0   :  { %11 = vsyncpa [#allocation5], 0  ;;  %s387_s0 = inlined_call_operand.<no memory space> [shape: s32[1], index: 0, kind: input, shape index: {}]   ;;  %s388_s1 = inlined_call_operand.hbm [shape: f32[4,512], index: 1, kind: input, shape index: {}]   ;;  %s389_s2 = inlined_call_operand.hbm [shape: f32[4,512], index: 2, kind: input, shape index: {}]   ;;  %s390_s3 = inlined_call_operand.hbm [shape: f32[4,512], index: 3, kind: output, shape index: {0}]   ;;  %s391_s4 = inlined_call_operand.hbm [shape: f32[4,512], index: 4, kind: output, shape index: {1}]  }
   0x1   :  { %12 = vsyncpa [#allocation8], 0 }
   0x2   :  { %13 = vsyncpa [#allocation6], 0 }
   0x3   :  { %14 = vsyncpa [#allocation11], 0  ;;  %s317_s15 = smov [#allocation4]   ;;  %s318_s17 = smov [#allocation7]  }
   0x4   :  { %s21_s16 = sshll.u32 %s317_s15, 4  ;;  %s31_s18 = sshll.u32 %s318_s17, 4  ;;  %s22_s16 = int_to_ptr.vmem [resolvable:$true] %s21_s16  ;;  %s32_s18 = int_to_ptr.vmem [resolvable:$true] %s31_s18 }
   0x5   :  { %s237_s19 = scalar_lea.vmem %s22_s16, 256  ;;  %p242_p1 = scmp.lt.s32.totalorder %s22_s16, %s22_s16 }
   0x6   :  { %p238_p0 = scmp.ne.s32.totalorder %s22_s16, %s237_s19  ;;  %p243_p2 = scmp.lt.s32.totalorder %s237_s19, %s237_s19 }
   0x8   :  { %p244_p3 = por %p243_p2, %p242_p1 }
   0xa   :  { %p245_p4 = pnand %p244_p3, %p238_p0 }
   0xc   :  { %248 = shalt.err (!%p245_p4)
}
   0xd   :  { %24 = dma.hbm_to_vmem [thread:$0]  %s388_s1, 256, %s22_s16, [#allocation5]  }
   0xe   :  { %s257_s22 = scalar_lea.vmem %s32_s18, 256  ;;  %p262_p6 = scmp.lt.s32.totalorder %s32_s18, %s32_s18 }
   0xf   :  { %p258_p5 = scmp.ne.s32.totalorder %s32_s18, %s257_s22  ;;  %p263_p7 = scmp.lt.s32.totalorder %s257_s22, %s257_s22 }
  0x11   :  { %p264_p8 = por %p263_p7, %p262_p6 }
  0x13   :  { %p265_p9 = pnand %p264_p8, %p258_p5 }
  0x15   :  { %268 = shalt.err (!%p265_p9)
}
  0x16   :  { %34 = dma.hbm_to_vmem [thread:$0]  %s389_s2, 256, %s32_s18, [#allocation8]  }
  0x17   :  { %309 = dma.done.wait [#allocation5], 256  }
  0x18   :  { %310 = vsyncadd [#allocation5], 4294967040 }
  0x19   :  { %311 = dma.done.wait [#allocation8], 256  }
  0x1a   :  { %312 = vsyncadd [#allocation8], 4294967040  ;;  %v41_v0 = vlaneseq  ;;  %s57_s26 = smul.u32 2654435769, %s387_s0  ;;  %v147_v12 = vld [vmem:[#allocation4] sm:$0xff]  ;;  %v148_v13 = vld [vmem:[#allocation4 + $0x8] sm:$0xff] }
  0x1b   :  { %v171_v14 = vld [vmem:[#allocation7] sm:$0xff]  ;;  %v355_v17 = vmul.f32 2.0, %v147_v12  ;;  %v357_v18 = vmul.f32 2.0, %v148_v13  ;;  %v172_v19 = vld [vmem:[#allocation7 + $0x8] sm:$0xff]  ;;  %s319_s0 = smov [#allocation9]  }
  0x1c   :  { %v42_v1 = vshrl.u32 %v41_v0, 7  ;;  %v44_v2 = vand.u32 127, %v41_v0  ;;  %v62_v11 = vstv %s57_s26  ;;  %v359_v22 = vmul.f32 2.0, %v171_v14  ;;  %s201_s2 = sshll.u32 %s319_s0, 4  ;;  %s202_s2 = int_to_ptr.vmem [resolvable:$true] %s201_s2 }
  0x1d   :  { %v153_v25 = vcombine.high %v355_v17, %v355_v17  ;;  %v363_v26 = vmul.f32 2.0, %v172_v19  ;;  %v154_v33 = vcombine.high %v357_v18, %v357_v18  ;;  %s269_s27 = scalar_lea.vmem %s202_s2, 256  ;;  %p274_p11 = scmp.lt.s32.totalorder %s202_s2, %s202_s2 }
  0x1e   :  { %v45_v3 = vadd.s32 128, %v44_v2  ;;  %v51_v4 = vmul.u32 512, %v42_v1  ;;  %v46_v5 = vadd.s32 256, %v44_v2  ;;  %v47_v6 = vadd.s32 384, %v44_v2  ;;  %p270_p10 = scmp.ne.s32.totalorder %s202_s2, %s269_s27  ;;  %p275_p12 = scmp.lt.s32.totalorder %s269_s27, %s269_s27 }
  0x20   :  { %v52_v7 = vadd.s32 %v51_v4, %v44_v2  ;;  %v53_v8 = vadd.s32 %v51_v4, %v45_v3  ;;  %v54_v9 = vadd.s32 %v51_v4, %v46_v5  ;;  %v55_v10 = vadd.s32 %v51_v4, %v47_v6  ;;  %p276_p13 = por %p275_p12, %p274_p11 }
  0x22   :  { %v58_v15 = vmul.u32 2, %v52_v7  ;;  %v59_v16 = vmul.u32 2, %v53_v8  ;;  %p277_p0 = pnand %p276_p13, %p270_p10 }
  0x23   :  { %v60_v20 = vmul.u32 2, %v54_v9  ;;  %v61_v21 = vmul.u32 2, %v55_v10  ;;  %v177_v9 = vcombine.high %v359_v22, %v359_v22 }
  0x24   :  { %v63_v23 = vadd.s32 %v62_v11, %v58_v15  ;;  %v64_v24 = vadd.s32 %v62_v11, %v59_v16  ;;  %v103_v29 = vadd.s32 1, %v58_v15  ;;  %v104_v30 = vadd.s32 1, %v59_v16 }
  0x25   :  { %v65_v27 = vadd.s32 %v62_v11, %v60_v20  ;;  %v66_v28 = vadd.s32 %v62_v11, %v61_v21  ;;  %v105_v34 = vadd.s32 1, %v60_v20  ;;  %v106_v41 = vadd.s32 1, %v61_v21 }
  0x26   :  { %v67_v31 = vshrl.u32 %v63_v23, 16  ;;  %v68_v32 = vshrl.u32 %v64_v24, 16  ;;  %v107_v37 = vadd.s32 %v103_v29, %v62_v11  ;;  %v108_v38 = vadd.s32 %v104_v30, %v62_v11 }
  0x27   :  { %v69_v35 = vshrl.u32 %v65_v27, 16  ;;  %v70_v36 = vshrl.u32 %v66_v28, 16  ;;  %v109_v42 = vadd.s32 %v105_v34, %v62_v11  ;;  %v110_v49 = vadd.s32 %v106_v41, %v62_v11 }
  0x28   :  { %v71_v39 = vxor.u32 %v67_v31, %v63_v23  ;;  %v72_v40 = vxor.u32 %v68_v32, %v64_v24  ;;  %v111_v45 = vshrl.u32 %v107_v37, 16  ;;  %v112_v46 = vshrl.u32 %v108_v38, 16 }
  0x29   :  { %v73_v43 = vxor.u32 %v69_v35, %v65_v27  ;;  %v74_v44 = vxor.u32 %v70_v36, %v66_v28  ;;  %v113_v50 = vshrl.u32 %v109_v42, 16  ;;  %v114_v57 = vshrl.u32 %v110_v49, 16 }
  0x2a   :  { %v75_v47 = vmul.u32 2146121005, %v71_v39  ;;  %v76_v48 = vmul.u32 2146121005, %v72_v40  ;;  %v115_v53 = vxor.u32 %v111_v45, %v107_v37  ;;  %v116_v54 = vxor.u32 %v112_v46, %v108_v38 }
  0x2b   :  { %v77_v51 = vmul.u32 2146121005, %v73_v43  ;;  %v78_v52 = vmul.u32 2146121005, %v74_v44  ;;  %v117_v58 = vxor.u32 %v113_v50, %v109_v42  ;;  %v118_v1 = vxor.u32 %v114_v57, %v110_v49 }
  0x2c   :  { %v79_v55 = vshrl.u32 %v75_v47, 15  ;;  %v80_v56 = vshrl.u32 %v76_v48, 15  ;;  %v119_v61 = vmul.u32 2146121005, %v115_v53  ;;  %v120_v62 = vmul.u32 2146121005, %v116_v54 }
  0x2d   :  { %v81_v59 = vshrl.u32 %v77_v51, 15  ;;  %v82_v60 = vshrl.u32 %v78_v52, 15  ;;  %v121_v2 = vmul.u32 2146121005, %v117_v58  ;;  %v122_v19 = vmul.u32 2146121005, %v118_v1 }
  0x2e   :  { %v83_v63 = vxor.u32 %v79_v55, %v75_v47  ;;  %v84_v0 = vxor.u32 %v80_v56, %v76_v48  ;;  %v123_v5 = vshrl.u32 %v119_v61, 15  ;;  %v124_v6 = vshrl.u32 %v120_v62, 15 }
  0x2f   :  { %v85_v3 = vxor.u32 %v81_v59, %v77_v51  ;;  %v86_v4 = vxor.u32 %v82_v60, %v78_v52  ;;  %v125_v10 = vshrl.u32 %v121_v2, 15  ;;  %v126_v30 = vshrl.u32 %v122_v19, 15 }
  0x30   :  { %v87_v7 = vmul.u32 2221713035, %v83_v63  ;;  %v88_v8 = vmul.u32 2221713035, %v84_v0  ;;  %v127_v13 = vxor.u32 %v123_v5, %v119_v61  ;;  %v128_v14 = vxor.u32 %v124_v6, %v120_v62 }
  0x31   :  { %v89_v11 = vmul.u32 2221713035, %v85_v3  ;;  %v90_v12 = vmul.u32 2221713035, %v86_v4  ;;  %v129_v20 = vxor.u32 %v125_v10, %v121_v2  ;;  %v130_v37 = vxor.u32 %v126_v30, %v122_v19 }
  0x32   :  { %v91_v15 = vshrl.u32 %v87_v7, 16  ;;  %v92_v16 = vshrl.u32 %v88_v8, 16  ;;  %v131_v24 = vmul.u32 2221713035, %v127_v13  ;;  %v132_v27 = vmul.u32 2221713035, %v128_v14 }
  0x33   :  { %v93_v21 = vshrl.u32 %v89_v11, 16  ;;  %v94_v23 = vshrl.u32 %v90_v12, 16  ;;  %v133_v31 = vmul.u32 2221713035, %v129_v20  ;;  %v134_v47 = vmul.u32 2221713035, %v130_v37 }
  0x34   :  { %v95_v28 = vxor.u32 %v91_v15, %v87_v7  ;;  %v96_v29 = vxor.u32 %v92_v16, %v88_v8  ;;  %v135_v35 = vshrl.u32 %v131_v24, 16  ;;  %v136_v36 = vshrl.u32 %v132_v27, 16 }
  0x35   :  { %v97_v32 = vxor.u32 %v93_v21, %v89_v11  ;;  %v98_v34 = vxor.u32 %v94_v23, %v90_v12  ;;  %v137_v38 = vshrl.u32 %v133_v31, 16  ;;  %v178_v50 = vcombine.high %v363_v26, %v363_v26 }
  0x36   :  { %vm99_vm0 = vcmp.lt.u32.totalorder %v95_v28, 2147483648  ;;  %vm100_vm1 = vcmp.lt.u32.totalorder %v96_v29, 2147483648  ;;  %v139_v44 = vxor.u32 %v135_v35, %v131_v24  ;;  %v140_v46 = vxor.u32 %v136_v36, %v132_v27 }
  0x37   :  { %v157_v39 = vsel %vm99_vm0, %v355_v17, 0.0  ;;  %v158_v40 = vsel %vm100_vm1, %v153_v25, 0.0  ;;  %vm101_vm2 = vcmp.lt.u32.totalorder %v97_v32, 2147483648  ;;  %vm102_vm3 = vcmp.lt.u32.totalorder %v98_v34, 2147483648 }
  0x38   :  { %v165_v41 = vcombine.low %v157_v39, %v158_v40  ;;  %v159_v42 = vsel %vm101_vm2, %v357_v18, 0.0  ;;  %v160_v43 = vsel %vm102_vm3, %v154_v33, 0.0  ;;  %v141_v48 = vxor.u32 %v137_v38, %v133_v31 }
  0x39   :  { %v166_v45 = vcombine.low %v159_v42, %v160_v43  ;;  %vm143_vm4 = vcmp.lt.u32.totalorder %v139_v44, 2147483648  ;;  %vm144_vm5 = vcmp.lt.u32.totalorder %v140_v46, 2147483648  ;;  %v138_v25 = vshrl.u32 %v134_v47, 16 }
  0x3a   :  { %169 = vst [vmem:[#allocation9] sm:$0xff] %v165_v41  ;;  %v181_v17 = vsel %vm143_vm4, %v359_v22, 0.0  ;;  %vm145_vm6 = vcmp.lt.u32.totalorder %v141_v48, 2147483648  ;;  %v182_v49 = vsel %vm144_vm5, %v177_v9, 0.0 }
  0x3b   :  { %170 = vst [vmem:[#allocation9 + $0x8] sm:$0xff] %v166_v45 }
  0x3c   :  { %280 = shalt.err (!%p277_p0)
}
  0x3d   :  { %204 = dma.vmem_to_hbm [thread:$0]  %s202_s2, 256, %s390_s3, [#allocation6]   ;;  %v189_v18 = vcombine.low %v181_v17, %v182_v49  ;;  %v142_v33 = vxor.u32 %v138_v25, %v134_v47  ;;  %v183_v22 = vsel %vm145_vm6, %v363_v26, 0.0 }
  0x3e   :  { %s320_s30 = smov [#allocation10]  }
  0x3f   :  { %s211_s5 = sshll.u32 %s320_s30, 4  ;;  %193 = vst [vmem:[#allocation10] sm:$0xff] %v189_v18  ;;  %vm146_vm7 = vcmp.lt.u32.totalorder %v142_v33, 2147483648  ;;  %s212_s5 = int_to_ptr.vmem [resolvable:$true] %s211_s5 }
  0x40   :  { %v184_v51 = vsel %vm146_vm7, %v178_v50, 0.0  ;;  %s289_s6 = scalar_lea.vmem %s212_s5, 256  ;;  %p294_p2 = scmp.lt.s32.totalorder %s212_s5, %s212_s5 }
  0x41   :  { %v190_v52 = vcombine.low %v183_v22, %v184_v51  ;;  %p290_p1 = scmp.ne.s32.totalorder %s212_s5, %s289_s6  ;;  %p295_p3 = scmp.lt.s32.totalorder %s289_s6, %s289_s6 }
  0x43   :  { %194 = vst [vmem:[#allocation10 + $0x8] sm:$0xff] %v190_v52  ;;  %p296_p4 = por %p295_p3, %p294_p2 }
  0x45   :  { %p297_p5 = pnand %p296_p4, %p290_p1 }
  0x47   :  { %300 = shalt.err (!%p297_p5)
}
  0x48   :  { %214 = dma.vmem_to_hbm [thread:$0]  %s212_s5, 256, %s391_s4, [#allocation11]  }
  0x49   :  { %313 = dma.done.wait [#allocation6], 256  }
  0x4a   :  { %314 = vsyncadd [#allocation6], 4294967040 }
  0x4b   :  { %315 = dma.done.wait [#allocation11], 256  }
  0x4c   :  { %316 = vsyncadd [#allocation11], 4294967040 }
  0x4d   :  { %221 = vsyncpa [#allocation5], 1 }
  0x4e   :  { %222 = vsyncpa [#allocation8], 1 }
  0x4f   :  { %223 = vsyncpa [#allocation6], 1 }
  0x50   :  { %224 = vsyncpa [#allocation11], 1 }

</bundles_post_ra>
